<compile_context>
chip_gen: v5e
topology: v5e:2x2
jax: 0.10.0
libtpu: 0.0.40
codegen_flags: <defaults>
</compile_context>

<pallas_src>
import functools
import math

import jax
import jax.numpy as jnp
from jax.experimental import pallas as pl
from jax.experimental.pallas import tpu as pltpu


def _ce_kernel(logits_ref, labels_ref, loss_ref, stats_ref, *,
               ignore_index, thresh_neg_log, hw, tile, mask_tail):
    # logits_ref: (C, T); labels_ref: (1, T) int32; loss_ref: (1, T) f32; stats_ref: (1, 128) f32
    x = logits_ref[...]
    if x.dtype != jnp.float32 and x.dtype != jnp.bfloat16:
        x = x.astype(jnp.float32)          # keep f32/bf16 native; promote anything else
    lab = labels_ref[...]                  # (1, T)

    # Numerically stable log-sum-exp over the class (sublane) axis.
    # Elementwise ops run in the input dtype (bf16 VPU/EUP on v6e/v7x);
    # reductions accumulate in f32.
    m = jnp.max(x, axis=0, keepdims=True)                             # (1, T)
    e = jnp.exp(x - m)                                                # (C, T) on EUP
    denom = jnp.sum(e.astype(jnp.float32), axis=0, keepdims=True)     # (1, T) f32
    lse = jnp.log(denom) + m.astype(jnp.float32)

    # Logit at the label index via masked select (no float one-hot temporary).
    c_iota = jax.lax.broadcasted_iota(jnp.int32, x.shape, 0)          # (C, T)
    picked = jnp.sum(jnp.where(c_iota == lab, x, 0.0).astype(jnp.float32),
                     axis=0, keepdims=True)                           # (1, T) f32

    loss = lse - picked                                               # (1, T) f32

    valid = lab != ignore_index
    if mask_tail:
        # grid = cdiv(HW, tile): mask out-of-bounds lanes of the last block.
        lane = jax.lax.broadcasted_iota(jnp.int32, lab.shape, 1)
        valid = valid & ((pl.program_id(1) * tile + lane) < hw)
    loss = jnp.where(valid, loss, 0.0)
    loss_ref[...] = loss.astype(loss_ref.dtype)

    # Fused OHEM partial statistics for this block: [n_valid, n_hard, sum_hard].
    hard = loss > thresh_neg_log           # ignored / OOB lanes are 0.0 -> never "hard"
    nv = jnp.sum(valid.astype(jnp.float32), axis=1, keepdims=True)    # (1, 1)
    nh = jnp.sum(hard.astype(jnp.float32), axis=1, keepdims=True)     # (1, 1)
    sh = jnp.sum(jnp.where(hard, loss, 0.0), axis=1, keepdims=True)   # (1, 1)
    lane128 = jax.lax.broadcasted_iota(jnp.int32, (1, 128), 1)
    stats_ref[...] = (jnp.where(lane128 == 0, nv, 0.0)
                      + jnp.where(lane128 == 1, nh, 0.0)
                      + jnp.where(lane128 == 2, sh, 0.0))


def _tile_and_vmem(hw, c, esize, n_batch):
    """Pick the lane-tile size from a VMEM budget. Returns (tile, aligned, vmem_limit_bytes)."""
    try:
        phys = int(getattr(pltpu.get_tpu_info(), "vmem_capacity_bytes", 64 << 20))
    except Exception:
        phys = 64 << 20                          # conservative: v7x physical VMEM
    vmem_limit = min(phys * 3 // 4, 96 << 20)    # scoped VMEM we request from Mosaic
    tile_budget = vmem_limit // 2                # headroom for pipeline internals

    # Rough per-lane-element VMEM cost of one block:
    #   double-buffered logits (2*C*esize) + ~3 live f32 (C,T) temporaries (12*C)
    #   + double-buffered labels + loss rows (16 B).
    per_elem = c * (2 * esize + 12) + 16
    cap = (tile_budget // per_elem) // 128 * 128
    cap = max(128, min(cap, 32768))
    hw_pad = -(-hw // 128) * 128
    cap = min(cap, hw_pad)
    if n_batch == 1 and hw >= 256:
        # keep >= 2 blocks on the pixel axis so both v7x TensorCores get work
        cap = min(cap, max(128, (hw // 2) // 128 * 128))

    t = cap
    while t >= 128:                              # prefer an exact divisor: full blocks
        if hw % t == 0:
            return t, True, vmem_limit
        t -= 128
    return cap, False, vmem_limit                # non-128-divisible HW: cdiv + tail mask


def _ce_pallas(logits_ncp, labels_n1p, *, ignore_index, thresh_neg_log,
               tile_p, aligned, vmem_limit):
    N, C, HW = logits_ncp.shape
    grid_hw = (HW // tile_p) if aligned else pl.cdiv(HW, tile_p)
    esize = jnp.dtype(logits_ncp.dtype).itemsize

    kernel = functools.partial(
        _ce_kernel, ignore_index=ignore_index, thresh_neg_log=thresh_neg_log,
        hw=HW, tile=tile_p, mask_tail=not aligned)

    cost = pl.CostEstimate(
        flops=6 * N * C * HW,
        transcendentals=N * C * HW,
        bytes_accessed=N * C * HW * esize + 3 * N * HW * 4 + N * grid_hw * 128 * 4,
    )

    return pl.pallas_call(
        kernel,
        out_shape=(
            jax.ShapeDtypeStruct((N, 1, HW), jnp.float32),
            jax.ShapeDtypeStruct((N, 1, grid_hw * 128), jnp.float32),
        ),
        grid_spec=pltpu.PrefetchScalarGridSpec(
            num_scalar_prefetch=0,
            grid=(N, grid_hw),
            in_specs=[
                pl.BlockSpec((pl.Squeezed(), C, tile_p), lambda n, i: (n, 0, i)),
                pl.BlockSpec((pl.Squeezed(), 1, tile_p), lambda n, i: (n, 0, i)),
            ],
            out_specs=[
                pl.BlockSpec((pl.Squeezed(), 1, tile_p), lambda n, i: (n, 0, i)),
                pl.BlockSpec((pl.Squeezed(), 1, 128), lambda n, i: (n, 0, i)),
            ],
        ),
        compiler_params=pltpu.CompilerParams(
            dimension_semantics=("parallel", "parallel"),
            vmem_limit_bytes=int(vmem_limit)),
        cost_estimate=cost,
    )(logits_ncp, labels_n1p)


def ohem_ce_loss(logits_nchw, labels, thresh=0.7, ignore_index=255):
    """Matches OHEM_CELoss.forward for logits (N,C,H,W) float, labels (N,H,W) int."""
    N, C, H, W = logits_nchw.shape
    HW = H * W
    P = N * HW
    thresh_neg_log = float(-math.log(thresh))

    # Contiguous reshapes only — no transpose / pad of the large logits operand.
    logits_ncp = logits_nchw.reshape(N, C, HW)
    labels_n1p = labels.reshape(N, 1, HW).astype(jnp.int32)

    esize = jnp.dtype(logits_nchw.dtype).itemsize
    tile_p, aligned, vmem_limit = _tile_and_vmem(HW, C, esize, N)

    loss_n1p, stats = _ce_pallas(
        logits_ncp, labels_n1p, ignore_index=ignore_index,
        thresh_neg_log=thresh_neg_log, tile_p=tile_p, aligned=aligned,
        vmem_limit=vmem_limit)

    loss = loss_n1p.reshape(P)
    stats = stats.reshape(-1, 128)                       # (N * grid_hw, 128)
    n_valid_f = jnp.sum(stats[:, 0])                     # exact integers while < 2^24 pixels
    n_hard_f = jnp.sum(stats[:, 1])
    sum_hard = jnp.sum(stats[:, 2])

    n_valid = n_valid_f.astype(jnp.int32)
    n_hard = n_hard_f.astype(jnp.int32)
    n_min = n_valid // 16
    mean_hard = sum_hard / jnp.maximum(n_hard_f, 1.0)

    # Fallback (mean of the top-n_min losses) only executes when triggered.
    # TODO(synk): replace the gated top_k with an in-kernel loss histogram + O(P)
    # threshold search if the fallback branch turns out to be hot in practice.
    k_max = max(P // 16, 1)

    def _fallback(_):
        top_vals, _idx = jax.lax.top_k(loss, k_max)
        rank = jax.lax.iota(jnp.int32, k_max)
        topk_sum = jnp.sum(jnp.where(rank < n_min, top_vals, 0.0))
        return topk_sum / jnp.maximum(n_min, 1).astype(jnp.float32)

    def _hard_mean(_):
        return mean_hard

    # NOTE: when n_valid == 0 this returns 0.0 (PyTorch would produce NaN from an
    # empty mean); otherwise semantics match OHEM_CELoss.forward.
    return jax.lax.cond(n_hard < n_min, _fallback, _hard_mean, jnp.float32(0))


if __name__ == "__main__":
    key = jax.random.PRNGKey(0)
    k1, k2, k3 = jax.random.split(key, 3)

    N, C, H, W = 2, 4, 16, 16
    logits = jax.random.normal(k1, (N, C, H, W), dtype=jnp.float32)
    labels = jax.random.randint(k2, (N, H, W), 0, C, dtype=jnp.int32)
    # sprinkle some ignore_index pixels
    ignore_mask = jax.random.uniform(k3, (N, H, W)) < 0.1
    labels = jnp.where(ignore_mask, 255, labels)

    out = jax.jit(ohem_ce_loss)(logits, labels)
    out = jax.block_until_ready(out)
    assert out.shape == () and bool(jnp.isfinite(out))
    print("KERNEL_OK")
</pallas_src>

<mosaic_0001>
module attributes {stable_mosaic.version = 11 : i64} {
  func.func @_ce_kernel(%arg0: i32, %arg1: i32, %arg2: memref<1x4x256xf32, #tpu.memory_space<vmem>>, %arg3: memref<1x1x256xi32, #tpu.memory_space<vmem>>, %arg4: memref<1x1x256xf32, #tpu.memory_space<vmem>>, %arg5: memref<1x1x128xf32, #tpu.memory_space<vmem>>) attributes {dimension_semantics = [#tpu.dimension_semantics<parallel>, #tpu.dimension_semantics<parallel>], iteration_bounds = array<i64: 2, 1>, scalar_prefetch = 0 : i64, scratch_operands = 0 : i64, tpu.core_type = #tpu.core_type<tc>, window_params = [{transform_indices = @transform_0, window_bounds = array<i64: 1, 4, 256>}, {transform_indices = @transform_1, window_bounds = array<i64: 1, 1, 256>}, {transform_indices = @transform_2, window_bounds = array<i64: 1, 1, 256>}, {transform_indices = @transform_3, window_bounds = array<i64: 1, 1, 128>}]} {
    %c0 = arith.constant 0 : index
    %c0_0 = arith.constant 0 : index
    %c0_1 = arith.constant 0 : index
    %0 = vector.load %arg2[%c0, %c0_0, %c0_1] : memref<1x4x256xf32, #tpu.memory_space<vmem>>, vector<1x4x256xf32>
    %1 = vector.shape_cast %0 : vector<1x4x256xf32> to vector<4x256xf32>
    %c0_2 = arith.constant 0 : index
    %c0_3 = arith.constant 0 : index
    %c0_4 = arith.constant 0 : index
    %2 = vector.load %arg3[%c0_2, %c0_3, %c0_4] : memref<1x1x256xi32, #tpu.memory_space<vmem>>, vector<1x1x256xi32>
    %3 = vector.shape_cast %2 : vector<1x1x256xi32> to vector<1x256xi32>
    %cst = arith.constant dense<0xFF800000> : vector<256xf32>
    %4 = vector.multi_reduction <maximumf>, %1, %cst [0] : vector<4x256xf32> to vector<256xf32>
    %5 = vector.shape_cast %4 : vector<256xf32> to vector<1x256xf32>
    %6 = vector.broadcast %5 : vector<1x256xf32> to vector<4x256xf32>
    %7 = arith.subf %1, %6 : vector<4x256xf32>
    %8 = math.exp %7 : vector<4x256xf32>
    %cst_5 = arith.constant dense<0.000000e+00> : vector<256xf32>
    %9 = vector.multi_reduction <add>, %8, %cst_5 [0] : vector<4x256xf32> to vector<256xf32>
    %10 = vector.shape_cast %9 : vector<256xf32> to vector<1x256xf32>
    %11 = math.log %10 : vector<1x256xf32>
    %12 = arith.addf %11, %5 : vector<1x256xf32>
    %13 = tpu.iota {dimensions = array<i32: 0>} : vector<4x256xi32>
    %14 = vector.broadcast %3 : vector<1x256xi32> to vector<4x256xi32>
    %15 = arith.cmpi eq, %13, %14 : vector<4x256xi32>
    %cst_6 = arith.constant 0.000000e+00 : f32
    %16 = vector.broadcast %cst_6 : f32 to vector<4x256xf32>
    %17 = arith.select %15, %1, %16 : vector<4x256xi1>, vector<4x256xf32>
    %cst_7 = arith.constant dense<0.000000e+00> : vector<256xf32>
    %18 = vector.multi_reduction <add>, %17, %cst_7 [0] : vector<4x256xf32> to vector<256xf32>
    %19 = vector.shape_cast %18 : vector<256xf32> to vector<1x256xf32>
    %20 = arith.subf %12, %19 : vector<1x256xf32>
    %c255_i32 = arith.constant 255 : i32
    %21 = vector.broadcast %c255_i32 : i32 to vector<1x256xi32>
    %22 = arith.cmpi ne, %3, %21 : vector<1x256xi32>
    %cst_8 = arith.constant 0.000000e+00 : f32
    %23 = vector.broadcast %cst_8 : f32 to vector<1x256xf32>
    %24 = arith.select %22, %20, %23 : vector<1x256xi1>, vector<1x256xf32>
    %c0_9 = arith.constant 0 : index
    %c0_10 = arith.constant 0 : index
    %c0_11 = arith.constant 0 : index
    %25 = vector.load %arg4[%c0_9, %c0_10, %c0_11] : memref<1x1x256xf32, #tpu.memory_space<vmem>>, vector<1x1x256xf32>
    %26 = vector.shape_cast %25 : vector<1x1x256xf32> to vector<1x256xf32>
    %27 = vector.shape_cast %24 : vector<1x256xf32> to vector<1x1x256xf32>
    tpu.vector_store %arg4[%c0_9, %c0_10, %c0_11], %27 {strides = array<i32>} : memref<1x1x256xf32, #tpu.memory_space<vmem>>, vector<1x1x256xf32>,
    %cst_12 = arith.constant 0.356674939 : f32
    %28 = vector.broadcast %cst_12 : f32 to vector<1x256xf32>
    %29 = arith.cmpf ogt, %24, %28 : vector<1x256xf32>
    %30 = arith.extui %22 : vector<1x256xi1> to vector<1x256xi32>
    %31 = arith.sitofp %30 : vector<1x256xi32> to vector<1x256xf32>
    %cst_13 = arith.constant dense<0.000000e+00> : vector<1xf32>
    %32 = vector.multi_reduction <add>, %31, %cst_13 [1] : vector<1x256xf32> to vector<1xf32>
    %33 = vector.shape_cast %32 : vector<1xf32> to vector<1x1xf32>
    %34 = arith.extui %29 : vector<1x256xi1> to vector<1x256xi32>
    %35 = arith.sitofp %34 : vector<1x256xi32> to vector<1x256xf32>
    %cst_14 = arith.constant dense<0.000000e+00> : vector<1xf32>
    %36 = vector.multi_reduction <add>, %35, %cst_14 [1] : vector<1x256xf32> to vector<1xf32>
    %37 = vector.shape_cast %36 : vector<1xf32> to vector<1x1xf32>
    %cst_15 = arith.constant 0.000000e+00 : f32
    %38 = vector.broadcast %cst_15 : f32 to vector<1x256xf32>
    %39 = arith.select %29, %24, %38 : vector<1x256xi1>, vector<1x256xf32>
    %cst_16 = arith.constant dense<0.000000e+00> : vector<1xf32>
    %40 = vector.multi_reduction <add>, %39, %cst_16 [1] : vector<1x256xf32> to vector<1xf32>
    %41 = vector.shape_cast %40 : vector<1xf32> to vector<1x1xf32>
    %42 = tpu.iota {dimensions = array<i32: 1>} : vector<1x128xi32>
    %c0_i32 = arith.constant 0 : i32
    %43 = vector.broadcast %c0_i32 : i32 to vector<1x128xi32>
    %44 = arith.cmpi eq, %42, %43 : vector<1x128xi32>
    %cst_17 = arith.constant 0.000000e+00 : f32
    %45 = vector.shape_cast %33 : vector<1x1xf32> to vector<1x1xf32>
    %46 = vector.broadcast %45 : vector<1x1xf32> to vector<1x128xf32>
    %47 = vector.broadcast %cst_17 : f32 to vector<1x128xf32>
    %48 = arith.select %44, %46, %47 : vector<1x128xi1>, vector<1x128xf32>
    %c1_i32 = arith.constant 1 : i32
    %49 = vector.broadcast %c1_i32 : i32 to vector<1x128xi32>
    %50 = arith.cmpi eq, %42, %49 : vector<1x128xi32>
    %cst_18 = arith.constant 0.000000e+00 : f32
    %51 = vector.shape_cast %37 : vector<1x1xf32> to vector<1x1xf32>
    %52 = vector.broadcast %51 : vector<1x1xf32> to vector<1x128xf32>
    %53 = vector.broadcast %cst_18 : f32 to vector<1x128xf32>
    %54 = arith.select %50, %52, %53 : vector<1x128xi1>, vector<1x128xf32>
    %55 = arith.addf %48, %54 : vector<1x128xf32>
    %c2_i32 = arith.constant 2 : i32
    %56 = vector.broadcast %c2_i32 : i32 to vector<1x128xi32>
    %57 = arith.cmpi eq, %42, %56 : vector<1x128xi32>
    %cst_19 = arith.constant 0.000000e+00 : f32
    %58 = vector.shape_cast %41 : vector<1x1xf32> to vector<1x1xf32>
    %59 = vector.broadcast %58 : vector<1x1xf32> to vector<1x128xf32>
    %60 = vector.broadcast %cst_19 : f32 to vector<1x128xf32>
    %61 = arith.select %57, %59, %60 : vector<1x128xi1>, vector<1x128xf32>
    %62 = arith.addf %55, %61 : vector<1x128xf32>
    %c0_20 = arith.constant 0 : index
    %c0_21 = arith.constant 0 : index
    %c0_22 = arith.constant 0 : index
    %63 = vector.load %arg5[%c0_20, %c0_21, %c0_22] : memref<1x1x128xf32, #tpu.memory_space<vmem>>, vector<1x1x128xf32>
    %64 = vector.shape_cast %63 : vector<1x1x128xf32> to vector<1x128xf32>
    %65 = vector.shape_cast %62 : vector<1x128xf32> to vector<1x1x128xf32>
    tpu.vector_store %arg5[%c0_20, %c0_21, %c0_22], %65 {strides = array<i32>} : memref<1x1x128xf32, #tpu.memory_space<vmem>>, vector<1x1x128xf32>,
    return
  }
  func.func @transform_0(%arg0: i32, %arg1: i32) -> (i32, i32, i32) {
    %c0_i32 = arith.constant 0 : i32
    %c0_i32_0 = arith.constant 0 : i32
    return %arg0, %c0_i32, %arg1 : i32, i32, i32
  }
  func.func @transform_1(%arg0: i32, %arg1: i32) -> (i32, i32, i32) {
    %c0_i32 = arith.constant 0 : i32
    %c0_i32_0 = arith.constant 0 : i32
    return %arg0, %c0_i32, %arg1 : i32, i32, i32
  }
  func.func @transform_2(%arg0: i32, %arg1: i32) -> (i32, i32, i32) {
    %c0_i32 = arith.constant 0 : i32
    %c0_i32_0 = arith.constant 0 : i32
    return %arg0, %c0_i32, %arg1 : i32, i32, i32
  }
  func.func @transform_3(%arg0: i32, %arg1: i32) -> (i32, i32, i32) {
    %c0_i32 = arith.constant 0 : i32
    %c0_i32_0 = arith.constant 0 : i32
    return %arg0, %c0_i32, %arg1 : i32, i32, i32
  }
}

</mosaic_0001>

<bundles_post_ra>
// kernel: ohem_ce_loss.1
= control target key start
LH: loop header
LB: loop body
LE: loop exit
PB: predicated region body
PF: predicated region fallthrough
CT: control target
= control target key end

     0   :  { %s625_s12 = smov 0   ;;  %s627_s13 = smov 0   ;;  %s701_s0 = inlined_call_operand.vmem [shape: f32[2,4,256], index: 0, kind: input, shape index: {}]   ;;  %s702_s1 = inlined_call_operand.vmem [shape: s32[2,1,256], index: 1, kind: input, shape index: {}]   ;;  %s703_s2 = inlined_call_operand.vmem [shape: f32[2,1,256], index: 2, kind: output, shape index: {0}]   ;;  %s704_s3 = inlined_call_operand.vmem [shape: f32[2,1,128], index: 3, kind: output, shape index: {1}]  }
   0x1   :  { %s629_s14 = smov 0  }
   0x2 LB: > { %s26_s15 = sadd.s32 1, %s598_s13  ;;  %p539_p0 = scmp.ge.s32.totalorder %s602_s14, 1  ;;  %s602_s14 = sphi %s629_s14, %s14_s14   ;;  %s598_s13 = sphi %s627_s13, %s706_s13   ;;  %s594_s12 = sphi %s625_s12, %s705_s12  }
   0x3   : > { %p28_p1 = scmp.ge.s32.totalorder %s26_s15, 2  ;;  %p179_p2 = scmp.lt.s32.totalorder %s602_s14, 3 }
   0x5   : > { %s708_s15 = smov (%p28_p1, %s26_s15), 0  ;;  %p180_p3 = pnand %p539_p0, %p179_p2 }
   0x6   : > { %p225_p4 = scmp.lt.s32.totalorder (!%p180_p3), %s594_s12, 1 }
   0x7   : > { %183 = sbr.rel (%p180_p3) target bundleno = 220 (0xdc), region = 28 }
   0xc   : > { %s710_s12 = smov (!%p225_p4, %s594_s12), 1  ;;  %vm348_vm1 = vcmask 1040384   ;;  %v604_v2 = vmov 0.0   ;;  %vm266_vm2 = vcmask 1043456   ;;  %v315_v30 = vlaneseq }
   0xd   : > { %s542_s16 = sshll.u32 %s710_s12, 1  ;;  %s548_s17 = sshll.u32 %s710_s12, 3 }
   0xe   : > { %s241_s20 = scalar_lea.vmem %s702_s1, %s542_s16  ;;  %s232_s23 = scalar_lea.vmem %s701_s0, %s548_s17  ;;  %v316_v33 = vshrl.u32 %v315_v30, 7  ;;  %vm354_vm5 = vcmp.lt.s32.totalorder %v315_v30, 256 }
   0xf   : > { %v652_v0 = vld [vmem:[%s241_s20] sm:$0x3]  ;;  %s250_s26 = scalar_lea.vmem %s703_s2, %s542_s16  ;;  %s257_s29 = scalar_lea.vmem %s704_s3, %s710_s12 }
  0x10   : > { %vm344_vm0 = vcmp.ne.s32.totalorder %v652_v0, 255  ;;  %v258_v1 = vld [vmem:[%s232_s23] sm:$0xff]  ;;  %v317_v38 = vperm.slane %v652_v0, 0  ;;  %v318_v39 = vperm.slane %v652_v0, 1 }
  0x11   : > { %v544_v3 = vsel %vm344_vm0, 1.0, %v604_v2  ;;  %261 = vst [vmem:[#allocation1] ss:$2 sm:$0xff] %v258_v1 }
  0x12   : > { %v361_v4 = vperm.slane %v544_v3, 0  ;;  %v362_v5 = vperm.slane %v544_v3, 1  ;;  %vm319_vm3 = vcmp.eq.s32.totalorder %v316_v33, %v317_v38  ;;  %vm320_vm4 = vcmp.eq.s32.totalorder %v316_v33, %v318_v39 }
  0x14   : > { %v365_v6 = vsel %vm348_vm1, %v361_v4, 0.0  ;;  %v366_v7 = vsel %vm348_vm1, %v362_v5, 0.0 }
  0x15   : > { %v367_v8 = vadd.f32 %v366_v7, %v365_v6 }
  0x17   : > { %368 = vadd.xlane.f32.xlu0 %v367_v8 }
  0x18   : > { %v262_v9 = vld.sshfl [vmem:[#allocation1] sm:$0xff pattern:$0x75316420]  ;;  %v263_v10 = vld.sshfl [vmem:[#allocation1 + $0x8] sm:$0xff pattern:$0x75316420] }
  0x19   : > { %v267_v11 = vsel %vm266_vm2, %v262_v9, -inf  ;;  %v274_v12 = vsel %vm266_vm2, %v263_v10, -inf }
  0x1a   : > { %v268_v13 = vrot.slane %v267_v11, 4  ;;  %v275_v14 = vrot.slane %v274_v12, 4 }
  0x1c   : > { %v269_v15 = vmax.f32 %v267_v11, %v268_v13  ;;  %v276_v16 = vmax.f32 %v274_v12, %v275_v14 }
  0x1e   : > { %v270_v17 = vrot.slane %v269_v15, 2  ;;  %v277_v18 = vrot.slane %v276_v16, 2 }
  0x20   : > { %v271_v19 = vmax.f32 %v269_v15, %v270_v17  ;;  %v278_v20 = vmax.f32 %v276_v16, %v277_v18 }
  0x22   : > { %v272_v21 = vrot.slane %v271_v19, 1  ;;  %v279_v22 = vrot.slane %v278_v20, 1 }
  0x24   : > { %v273_v23 = vmax.f32 %v271_v19, %v272_v21  ;;  %v280_v24 = vmax.f32 %v278_v20, %v279_v22 }
  0x26   : > { %v283_v25 = vrot.slane %v280_v24, 4 }
  0x28   : > { %v284_v26 = vsel %vm266_vm2, %v273_v23, %v283_v25 }
  0x29   : > { %v286_v27 = vsub.f32 %v258_v1, %v284_v26 }
  0x2b   : > { %v287_v28 = vmul.f32 1.442695, %v286_v27 }
  0x2d   : > { %574 = vpow2.f32 %v287_v28 }
  0x33   : > { %v575_v29 = vpop.eup %574 }
  0x34   : > { %290 = vst [vmem:[#allocation1] ss:$2 sm:$0xff] %v575_v29 }
  0x3b   : > { %v291_v31 = vld.sshfl [vmem:[#allocation1] sm:$0xff pattern:$0x75316420]  ;;  %v292_v32 = vld.sshfl [vmem:[#allocation1 + $0x8] sm:$0xff pattern:$0x75316420] }
  0x3c   : > { %v295_v34 = vsel %vm266_vm2, %v291_v31, 0.0  ;;  %v302_v35 = vsel %vm266_vm2, %v292_v32, 0.0  ;;  %321 = vst [vmem:[#allocation1] ss:$2 sm:$0xff] %v258_v1 }
  0x3d   : > { %v296_v36 = vrot.slane %v295_v34, 4  ;;  %v303_v37 = vrot.slane %v302_v35, 4 }
  0x3f   : > { %v297_v40 = vadd.f32 %v296_v36, %v295_v34  ;;  %v304_v41 = vadd.f32 %v303_v37, %v302_v35 }
  0x41   : > { %v298_v42 = vrot.slane %v297_v40, 2  ;;  %v305_v43 = vrot.slane %v304_v41, 2 }
  0x43   : > { %v299_v44 = vadd.f32 %v298_v42, %v297_v40  ;;  %v306_v45 = vadd.f32 %v305_v43, %v304_v41  ;;  %v322_v46 = vld.sshfl [vmem:[#allocation1] sm:$0xff pattern:$0x75316420]  ;;  %v323_v47 = vld.sshfl [vmem:[#allocation1 + $0x8] sm:$0xff pattern:$0x75316420] }
  0x44   : > { %v326_v48 = vsel %vm319_vm3, %v322_v46, 0.0  ;;  %v327_v49 = vsel %vm320_vm4, %v323_v47, 0.0 }
  0x45   : > { %v300_v50 = vrot.slane %v299_v44, 1  ;;  %v307_v51 = vrot.slane %v306_v45, 1  ;;  %v328_v52 = vsel %vm266_vm2, %v326_v48, 0.0  ;;  %v335_v53 = vsel %vm266_vm2, %v327_v49, 0.0 }
  0x46   : > { %v329_v54 = vrot.slane %v328_v52, 4  ;;  %v336_v55 = vrot.slane %v335_v53, 4 }
  0x47   : > { %v301_v56 = vadd.f32 %v300_v50, %v299_v44  ;;  %v308_v57 = vadd.f32 %v307_v51, %v306_v45 }
  0x48   : > { %v330_v58 = vadd.f32 %v329_v54, %v328_v52  ;;  %v337_v59 = vadd.f32 %v336_v55, %v335_v53 }
  0x49   : > { %576 = vlog2.f32 %v301_v56 }
  0x4a   : > { %578 = vlog2.f32 %v308_v57  ;;  %v331_v60 = vrot.slane %v330_v58, 2  ;;  %v338_v61 = vrot.slane %v337_v59, 2 }
  0x4c   : > { %v332_v62 = vadd.f32 %v331_v60, %v330_v58  ;;  %v339_v63 = vadd.f32 %v338_v61, %v337_v59 }
  0x4e   : > { %v333_v1 = vrot.slane %v332_v62, 1  ;;  %v340_v3 = vrot.slane %v339_v63, 1 }
  0x4f   : > { %v577_v4 = vpop.eup %576 }
  0x50   : > { %v579_v5 = vpop.eup %578  ;;  %v310_v6 = vmul.f32 0.6931472, %v577_v4  ;;  %v334_v8 = vadd.f32 %v333_v1, %v332_v62  ;;  %v341_v9 = vadd.f32 %v340_v3, %v339_v63 }
  0x51   : > { %v312_v7 = vmul.f32 0.6931472, %v579_v5 }
  0x52   : > { %v313_v10 = vadd.f32 %v310_v6, %v273_v23 }
  0x53   : > { %v314_v11 = vadd.f32 %v312_v7, %v280_v24 }
  0x54   : > { %v342_v12 = vsub.f32 %v313_v10, %v334_v8 }
  0x55   : > { %v343_v13 = vsub.f32 %v314_v11, %v341_v9 }
  0x57   : > { %v347_v14 = vrot.slane %v343_v13, 7 }
  0x59   : > { %v349_v15 = vsel %vm348_vm1, %v342_v12, %v347_v14 }
  0x5a   : > { %v351_v16 = vsel %vm344_vm0, %v349_v15, 0.0 }
  0x5b   : > { %356 = vst.msk [vmem:[%s250_s26] sm:$0x3] %vm354_vm5, %v351_v16  ;;  %vm357_vm6 = vcmp.gt.f32.partialorder %v351_v16, 0.35667494 }
  0x5c   : > { %v545_v17 = vsel %vm357_vm6, 1.0, %v604_v2  ;;  %v382_v18 = vsel %vm357_vm6, %v351_v16, 0.0  ;;  %v394_v2 = vand.u32 127, %v315_v30 }
  0x5d   : > { %v373_v19 = vperm.slane %v545_v17, 0  ;;  %v374_v20 = vperm.slane %v545_v17, 1  ;;  %v384_v21 = vperm.slane %v382_v18, 0  ;;  %v385_v22 = vperm.slane %v382_v18, 1 }
  0x5e   : > { %vm395_vm7 = vcmp.eq.s32.totalorder %v394_v2, 0  ;;  %vm397_vm8 = vcmp.eq.s32.totalorder %v394_v2, 1  ;;  %vm400_vm9 = vcmp.eq.s32.totalorder %v394_v2, 2 }
  0x5f   : > { %v377_v23 = vsel %vm348_vm1, %v373_v19, 0.0  ;;  %v378_v24 = vsel %vm348_vm1, %v374_v20, 0.0  ;;  %v388_v25 = vsel %vm348_vm1, %v384_v21, 0.0  ;;  %v389_v26 = vsel %vm348_vm1, %v385_v22, 0.0 }
  0x60   : > { %v379_v0 = vadd.f32 %v378_v24, %v377_v23  ;;  %v390_v27 = vadd.f32 %v389_v26, %v388_v25 }
  0x62   : > { %380 = vadd.xlane.f32.xlu0 %v379_v0  ;;  %391 = vadd.xlane.f32.xlu1 %v390_v27 }
  0x8a   : > { %v369_v28 = vpop.xlane.xlu0 %368 }
  0x8b   : > { %v396_v32 = vsel %vm395_vm7, %v369_v28, 0.0 }
  0xd5   : > { %v381_v29 = vpop.xlane.xlu0 %380  ;;  %v392_v31 = vpop.xlane.xlu1 %391 }
  0xd6   : > { %v398_v33 = vsel %vm397_vm8, %v381_v29, 0.0  ;;  %v401_v34 = vsel %vm400_vm9, %v392_v31, 0.0 }
  0xd7   : > { %v399_v35 = vadd.f32 %v398_v33, %v396_v32 }
  0xd9   : > { %v402_v36 = vadd.f32 %v401_v34, %v399_v35 }
  0xdb   : > { %403 = vst [vmem:[%s257_s29] sm:$0x1] %v402_v36 }
  0xdc PF: > { %s14_s14 = sadd.s32 1, %s602_s14   ;;  %s705_s12 = smov %s598_s13 }
  0xdd   : > { %p11_p5 = scmp.ge.s32.totalorder %s14_s14, 4   ;;  %s706_s13 = smov %s708_s15 }
  0xdf   :  { %13 = sbr.rel (!%p11_p5) target bundleno = 2 (0x2), region = 73 }

</bundles_post_ra>
